<compile_context>
chip_gen: v7x
topology: tpu7x:2x2x1
jax: 0.10.0
libtpu: 0.0.40
codegen_flags: <defaults>
</compile_context>

<pallas_src>
from functools import partial
import math

import jax
import jax.numpy as jnp
from jax import lax
from jax.experimental import pallas as pl
from jax.experimental.pallas import tpu as pltpu


def _pick_tile(n, max_tile=128):
    """Largest tile <= max_tile that divides n (multiple of 8 when actually tiling), else n."""
    if n <= max_tile:
        return n
    for cand in (128, 64, 32, 16, 8):
        if cand <= max_tile and n % cand == 0:
            return cand
    return n


# ---------------------------------------------------------------------------
# Q / K / V projection: (B, N, d_model) @ per-head weights -> head-major (B, H, N, E)
# ---------------------------------------------------------------------------
def _qkv_projection_kernel(x_ref, w_ref, b_ref, o_ref):
    # x_ref: (1, TN, Dm)  w_ref: (H, Dm, E)  b_ref: (H, 1, E)  o_ref: (1, H, TN, E)
    x = x_ref[0]
    n_heads = w_ref.shape[0]
    for h in range(n_heads):                       # static unroll; one 2-D MXU matmul per head
        y = lax.dot_general(x, w_ref[h], (((1,), (0,)), ((), ())),
                            preferred_element_type=jnp.float32)
        o_ref[0, h] = (y + b_ref[h]).astype(o_ref.dtype)


def qkv_projection(x, w, b):
    """x: (B, N, Dm), w: (H, Dm, E), b: (H, 1, E)  ->  (B, H, N, E) (head-major)."""
    B, N, Dm = x.shape
    H, _, E = w.shape
    tn = _pick_tile(N)
    return pl.pallas_call(
        _qkv_projection_kernel,
        out_shape=jax.ShapeDtypeStruct((B, H, N, E), x.dtype),
        grid_spec=pltpu.PrefetchScalarGridSpec(
            num_scalar_prefetch=0,
            grid=(B, N // tn),
            in_specs=[
                pl.BlockSpec((1, tn, Dm), lambda b, n: (b, n, 0)),
                pl.BlockSpec((H, Dm, E), lambda b, n: (0, 0, 0)),   # weights stay resident
                pl.BlockSpec((H, 1, E), lambda b, n: (0, 0, 0)),
            ],
            out_specs=pl.BlockSpec((1, H, tn, E), lambda b, n: (b, 0, n, 0)),
        ),
        compiler_params=pltpu.CompilerParams(
            dimension_semantics=("parallel", "parallel")),
    )(x, w, b)


# ---------------------------------------------------------------------------
# FullAttention core (head-major layout)
# ---------------------------------------------------------------------------
def _attention_kernel(*refs, scale, tl, mask_flag, has_mask):
    if has_mask:
        q_ref, k_ref, v_ref, mask_ref, o_ref, a_ref = refs
    else:
        q_ref, k_ref, v_ref, o_ref, a_ref = refs

    q = q_ref[0, 0] * scale                    # (TL, E); scale folded into Q (smaller tile)
    k = k_ref[0, 0]                            # (S, E)
    v = v_ref[0, 0]                            # (S, D)

    # scores[l, s] = sum_e q[l, e] * k[s, e]   (contraction on E, no explicit transpose)
    scores = lax.dot_general(q, k, (((1,), (1,)), ((), ())),
                             preferred_element_type=jnp.float32)   # (TL, S)

    if has_mask:
        # user-supplied mask: nonzero / True = masked
        scores = jnp.where(mask_ref[0, 0] != 0, -jnp.inf, scores)
    elif mask_flag:
        # TriangularCausalMask (triu, diagonal=1); global row = l_tile * TL + local row
        row0 = pl.program_id(2) * tl
        row = row0 + lax.broadcasted_iota(jnp.int32, scores.shape, 0)
        col = lax.broadcasted_iota(jnp.int32, scores.shape, 1)
        scores = jnp.where(col > row, -jnp.inf, scores)

    # numerically stable softmax along S
    m = jnp.max(scores, axis=-1, keepdims=True)
    e = jnp.exp(scores - m)
    denom = jnp.sum(e, axis=-1, keepdims=True)
    # EUP approximate reciprocal + one Newton-Raphson step: ~f32 accuracy, divide off the VALU
    r = pl.reciprocal(denom, approx=True)
    r = r * (2.0 - denom * r)
    attn = e * r                               # (TL, S)

    # TODO(synk): attention dropout (p=0.1) is identity in eval mode; not applied here.
    a_ref[0, 0] = attn.astype(a_ref.dtype)
    # cast probabilities to V's dtype (bf16-native MXU when inputs are bf16); f32 accumulate
    ctx = lax.dot_general(attn.astype(v.dtype), v, (((1,), (0,)), ((), ())),
                          preferred_element_type=jnp.float32)      # (TL, D)
    o_ref[0, 0] = ctx.astype(o_ref.dtype)


def full_attention(q, k, v, attn_mask=None, *, mask_flag=True, scale=None):
    """Head-major FullAttention.
    q: (B, H, L, E), k: (B, H, S, E), v: (B, H, S, D)
    Returns (context (B, H, L, D), attention map A (B, H, L, S))."""
    B, H, L, E = q.shape
    S = k.shape[2]
    D = v.shape[3]
    scale = (1.0 / math.sqrt(E)) if scale is None else scale
    tl = _pick_tile(L)

    has_mask = mask_flag and (attn_mask is not None)

    in_specs = [
        pl.BlockSpec((1, 1, tl, E), lambda b, h, l: (b, h, l, 0)),
        pl.BlockSpec((1, 1, S, E), lambda b, h, l: (b, h, 0, 0)),    # K resident across l
        pl.BlockSpec((1, 1, S, D), lambda b, h, l: (b, h, 0, 0)),    # V resident across l
    ]
    inputs = [q, k, v]
    if has_mask:
        m = jnp.asarray(attn_mask)
        if m.ndim == 2:                        # (L, S)
            m = m[None, None]
        elif m.ndim == 3:                      # (B, L, S)
            m = m[:, None]
        m = jnp.broadcast_to(m, (B, 1, L, S)).astype(jnp.int32)
        in_specs.append(pl.BlockSpec((1, 1, tl, S), lambda b, h, l: (b, 0, l, 0)))
        inputs.append(m)

    kernel = partial(_attention_kernel, scale=scale, tl=tl,
                     mask_flag=mask_flag, has_mask=has_mask)

    ctx, attn = pl.pallas_call(
        kernel,
        out_shape=(
            jax.ShapeDtypeStruct((B, H, L, D), q.dtype),
            # A kept in f32 to match the PyTorch module exactly; switch to bf16 here to
            # halve the (B,H,L,S) HBM writeback if the consumer tolerates it.
            jax.ShapeDtypeStruct((B, H, L, S), jnp.float32),
        ),
        grid_spec=pltpu.PrefetchScalarGridSpec(
            num_scalar_prefetch=0,
            grid=(B, H, L // tl),
            in_specs=in_specs,
            out_specs=[
                pl.BlockSpec((1, 1, tl, D), lambda b, h, l: (b, h, l, 0)),
                pl.BlockSpec((1, 1, tl, S), lambda b, h, l: (b, h, l, 0)),
            ],
        ),
        compiler_params=pltpu.CompilerParams(
            dimension_semantics=("parallel", "parallel", "parallel")),
    )(*inputs)
    return ctx, attn


# ---------------------------------------------------------------------------
# Output projection: head-major context (B, H, L, D) -> (B, L, d_model)
# ---------------------------------------------------------------------------
def _out_projection_kernel(x_ref, w_ref, b_ref, o_ref):
    # x_ref: (1, H, TL, D)  w_ref: (H, D, M)  b_ref: (1, M)  o_ref: (1, TL, M)
    n_heads = w_ref.shape[0]
    acc = jnp.zeros((x_ref.shape[2], w_ref.shape[2]), jnp.float32)
    for h in range(n_heads):                   # static unroll: acc += ctx_h @ Wo_h
        acc = acc + lax.dot_general(x_ref[0, h], w_ref[h], (((1,), (0,)), ((), ())),
                                    preferred_element_type=jnp.float32)
    o_ref[0] = (acc + b_ref[...]).astype(o_ref.dtype)


def out_projection(ctx, w, b):
    """ctx: (B, H, L, D) head-major, w: (H, D, M), b: (1, M)  ->  (B, L, M)."""
    B, H, L, D = ctx.shape
    M = w.shape[-1]
    tl = _pick_tile(L)
    return pl.pallas_call(
        _out_projection_kernel,
        out_shape=jax.ShapeDtypeStruct((B, L, M), ctx.dtype),
        grid_spec=pltpu.PrefetchScalarGridSpec(
            num_scalar_prefetch=0,
            grid=(B, L // tl),
            in_specs=[
                pl.BlockSpec((1, H, tl, D), lambda b, l: (b, 0, l, 0)),
                pl.BlockSpec((H, D, M), lambda b, l: (0, 0, 0)),
                pl.BlockSpec((1, M), lambda b, l: (0, 0)),
            ],
            out_specs=pl.BlockSpec((1, tl, M), lambda b, l: (b, l, 0)),
        ),
        compiler_params=pltpu.CompilerParams(
            dimension_semantics=("parallel", "parallel")),
    )(ctx, w, b)


# ---------------------------------------------------------------------------
# Module glue
# ---------------------------------------------------------------------------
def make_params(Wq, bq, Wk, bk, Wv, bv, Wo, bo, n_heads):
    """Split nn.Linear weights per head (trace-time reshapes of tiny weight tensors only)."""
    d_model = Wq.shape[0]
    D = Wo.shape[0] // n_heads

    def split_in(w, b):     # (Dm, H*E), (H*E,) -> (H, Dm, E), (H, 1, E)
        return (jnp.transpose(w.reshape(d_model, n_heads, -1), (1, 0, 2)),
                b.reshape(n_heads, 1, -1))

    wq, bq_h = split_in(Wq, bq)
    wk, bk_h = split_in(Wk, bk)
    wv, bv_h = split_in(Wv, bv)
    wo = Wo.reshape(n_heads, D, -1)             # (H, D, d_model)
    bo_h = bo.reshape(1, -1)                    # (1, d_model)
    return dict(wq=wq, bq=bq_h, wk=wk, bk=bk_h, wv=wv, bv=bv_h, wo=wo, bo=bo_h)


def self_attention_forward(params, queries, keys, values, attn_mask=None):
    """queries/keys/values: (B, L|S, d_model).  Returns (out (B, L, d_model), A (B, H, L, S))."""
    q = qkv_projection(queries, params["wq"], params["bq"])    # (B, H, L, E)
    k = qkv_projection(keys, params["wk"], params["bk"])       # (B, H, S, E)
    v = qkv_projection(values, params["wv"], params["bv"])     # (B, H, S, D)
    ctx, attn = full_attention(q, k, v, attn_mask)             # (B, H, L, D), (B, H, L, S)
    out = out_projection(ctx, params["wo"], params["bo"])      # (B, L, d_model)
    return out, attn


# ---------------------------------------------------------------------------
# Plain-JAX reference
# ---------------------------------------------------------------------------
def _reference(queries, keys, values, Wq, bq, Wk, bk, Wv, bv, Wo, bo, n_heads,
               attn_mask=None):
    hi = lax.Precision.HIGHEST
    B, L, _ = queries.shape
    _, S, _ = keys.shape
    H = n_heads
    q = (jnp.dot(queries, Wq, precision=hi) + bq).reshape(B, L, H, -1)
    k = (jnp.dot(keys, Wk, precision=hi) + bk).reshape(B, S, H, -1)
    v = (jnp.dot(values, Wv, precision=hi) + bv).reshape(B, S, H, -1)
    E = q.shape[-1]
    scale = 1.0 / math.sqrt(E)
    scores = jnp.einsum('blhe,bshe->bhls', q, k, precision=hi)
    if attn_mask is not None:
        m = jnp.asarray(attn_mask).astype(bool)
        if m.ndim == 2:
            m = m[None, None]
        elif m.ndim == 3:
            m = m[:, None]
        m = jnp.broadcast_to(m, (B, 1, L, S))
    else:
        m = jnp.triu(jnp.ones((L, S), dtype=bool), k=1)[None, None]
    scores = jnp.where(m, -jnp.inf, scores)
    A = jax.nn.softmax(scale * scores, axis=-1)
    ctx = jnp.einsum('bhls,bshd->blhd', A, v, precision=hi)
    out = jnp.dot(ctx.reshape(B, L, -1), Wo, precision=hi) + bo
    return out, A


if __name__ == "__main__":
    B, L, d_model, n_heads = 2, 8, 32, 4
    S = L
    E = d_model // n_heads          # d_keys = d_values = 8

    root = jax.random.PRNGKey(0)
    ks = jax.random.split(root, 11)
    queries = jax.random.normal(ks[0], (B, L, d_model), jnp.float32)
    keys_in = jax.random.normal(ks[1], (B, S, d_model), jnp.float32)
    values_in = jax.random.normal(ks[2], (B, S, d_model), jnp.float32)

    def init_linear(kw, kb, din, dout):
        bound = 1.0 / math.sqrt(din)           # nn.Linear default init
        w = jax.random.uniform(kw, (din, dout), jnp.float32, -bound, bound)
        b = jax.random.uniform(kb, (dout,), jnp.float32, -bound, bound)
        return w, b

    Wq, bq = init_linear(ks[3], ks[4], d_model, n_heads * E)
    Wk, bk = init_linear(ks[5], ks[6], d_model, n_heads * E)
    Wv, bv = init_linear(ks[7], ks[8], d_model, n_heads * E)
    Wo, bo = init_linear(ks[9], ks[10], n_heads * E, d_model)

    params = make_params(Wq, bq, Wk, bk, Wv, bv, Wo, bo, n_heads)
    fwd = jax.jit(self_attention_forward)

    # 1) default path: built-in causal mask (mask_flag=True, attn_mask=None)
    out, attn = fwd(params, queries, keys_in, values_in)
    out = jax.block_until_ready(out)
    attn = jax.block_until_ready(attn)
    out_ref, attn_ref = _reference(queries, keys_in, values_in,
                                   Wq, bq, Wk, bk, Wv, bv, Wo, bo, n_heads)
    assert out.shape == (B, L, d_model) and attn.shape == (B, n_heads, L, S)
    assert jnp.allclose(out, out_ref, atol=5e-4, rtol=5e-4), \
        float(jnp.max(jnp.abs(out - out_ref)))
    assert jnp.allclose(attn, attn_ref, atol=5e-4, rtol=5e-4), \
        float(jnp.max(jnp.abs(attn - attn_ref)))

    # 2) explicit attn_mask path (True = masked): banded causal mask (no fully-masked rows)
    row = jnp.arange(L)[:, None]
    col = jnp.arange(S)[None, :]
    band_mask = (col > row) | (col < row - 3)                  # (L, S) bool
    out_m, attn_m = fwd(params, queries, keys_in, values_in, band_mask)
    out_m = jax.block_until_ready(out_m)
    attn_m = jax.block_until_ready(attn_m)
    out_mref, attn_mref = _reference(queries, keys_in, values_in,
                                     Wq, bq, Wk, bk, Wv, bv, Wo, bo, n_heads,
                                     attn_mask=band_mask)
    assert jnp.allclose(out_m, out_mref, atol=5e-4, rtol=5e-4), \
        float(jnp.max(jnp.abs(out_m - out_mref)))
    assert jnp.allclose(attn_m, attn_mref, atol=5e-4, rtol=5e-4), \
        float(jnp.max(jnp.abs(attn_m - attn_mref)))

    print("KERNEL_OK")
</pallas_src>

<mosaic_0001>
module attributes {stable_mosaic.version = 11 : i64} {
  func.func @_qkv_projection_kernel(%arg0: i32, %arg1: i32, %arg2: memref<1x8x32xf32, #tpu.memory_space<vmem>>, %arg3: memref<4x32x8xf32, #tpu.memory_space<vmem>>, %arg4: memref<4x1x8xf32, #tpu.memory_space<vmem>>, %arg5: memref<1x4x8x8xf32, #tpu.memory_space<vmem>>) attributes {dimension_semantics = [#tpu.dimension_semantics<parallel>, #tpu.dimension_semantics<parallel>], iteration_bounds = array<i64: 2, 1>, scalar_prefetch = 0 : i64, scratch_operands = 0 : i64, tpu.core_type = #tpu.core_type<tc>, window_params = [{transform_indices = @transform_0, window_bounds = array<i64: 1, 8, 32>}, {pipeline_mode = #tpu.pipeline_mode<synchronous>, transform_indices = @transform_1, window_bounds = array<i64: 4, 32, 8>}, {pipeline_mode = #tpu.pipeline_mode<synchronous>, transform_indices = @transform_2, window_bounds = array<i64: 4, 1, 8>}, {transform_indices = @transform_3, window_bounds = array<i64: 1, 4, 8, 8>}]} {
    %c0 = arith.constant 0 : index
    %c0_0 = arith.constant 0 : index
    %c0_1 = arith.constant 0 : index
    %0 = vector.load %arg2[%c0, %c0_0, %c0_1] : memref<1x8x32xf32, #tpu.memory_space<vmem>>, vector<1x8x32xf32>
    %1 = vector.shape_cast %0 : vector<1x8x32xf32> to vector<8x32xf32>
    %c0_2 = arith.constant 0 : index
    %c0_3 = arith.constant 0 : index
    %c0_4 = arith.constant 0 : index
    %2 = vector.load %arg3[%c0_2, %c0_3, %c0_4] : memref<4x32x8xf32, #tpu.memory_space<vmem>>, vector<1x32x8xf32>
    %3 = vector.shape_cast %2 : vector<1x32x8xf32> to vector<32x8xf32>
    %cst = arith.constant dense<0.000000e+00> : vector<8x8xf32>
    %4 = tpu.matmul %1, %3, %cst {dimension_numbers = #tpu.dot_dimension_numbers<[1], [0], [0], [1], [0, 0, 1, 1], [], []>} : vector<8x32xf32>, vector<32x8xf32>, vector<8x8xf32> -> vector<8x8xf32>
    %c0_5 = arith.constant 0 : index
    %c0_6 = arith.constant 0 : index
    %c0_7 = arith.constant 0 : index
    %5 = vector.load %arg4[%c0_5, %c0_6, %c0_7] : memref<4x1x8xf32, #tpu.memory_space<vmem>>, vector<1x1x8xf32>
    %6 = vector.shape_cast %5 : vector<1x1x8xf32> to vector<1x8xf32>
    %7 = vector.broadcast %6 : vector<1x8xf32> to vector<8x8xf32>
    %8 = arith.addf %4, %7 : vector<8x8xf32>
    %c0_8 = arith.constant 0 : index
    %c0_9 = arith.constant 0 : index
    %c0_10 = arith.constant 0 : index
    %c0_11 = arith.constant 0 : index
    %9 = vector.load %arg5[%c0_8, %c0_9, %c0_10, %c0_11] : memref<1x4x8x8xf32, #tpu.memory_space<vmem>>, vector<1x1x8x8xf32>
    %10 = vector.shape_cast %9 : vector<1x1x8x8xf32> to vector<8x8xf32>
    %11 = vector.shape_cast %8 : vector<8x8xf32> to vector<1x1x8x8xf32>
    tpu.vector_store %arg5[%c0_8, %c0_9, %c0_10, %c0_11], %11 {strides = array<i32>} : memref<1x4x8x8xf32, #tpu.memory_space<vmem>>, vector<1x1x8x8xf32>,
    %c1 = arith.constant 1 : index
    %c0_12 = arith.constant 0 : index
    %c0_13 = arith.constant 0 : index
    %12 = vector.load %arg3[%c1, %c0_12, %c0_13] : memref<4x32x8xf32, #tpu.memory_space<vmem>>, vector<1x32x8xf32>
    %13 = vector.shape_cast %12 : vector<1x32x8xf32> to vector<32x8xf32>
    %cst_14 = arith.constant dense<0.000000e+00> : vector<8x8xf32>
    %14 = tpu.matmul %1, %13, %cst_14 {dimension_numbers = #tpu.dot_dimension_numbers<[1], [0], [0], [1], [0, 0, 1, 1], [], []>} : vector<8x32xf32>, vector<32x8xf32>, vector<8x8xf32> -> vector<8x8xf32>
    %c1_15 = arith.constant 1 : index
    %c0_16 = arith.constant 0 : index
    %c0_17 = arith.constant 0 : index
    %15 = vector.load %arg4[%c1_15, %c0_16, %c0_17] : memref<4x1x8xf32, #tpu.memory_space<vmem>>, vector<1x1x8xf32>
    %16 = vector.shape_cast %15 : vector<1x1x8xf32> to vector<1x8xf32>
    %17 = vector.broadcast %16 : vector<1x8xf32> to vector<8x8xf32>
    %18 = arith.addf %14, %17 : vector<8x8xf32>
    %c0_18 = arith.constant 0 : index
    %c1_19 = arith.constant 1 : index
    %c0_20 = arith.constant 0 : index
    %c0_21 = arith.constant 0 : index
    %19 = vector.load %arg5[%c0_18, %c1_19, %c0_20, %c0_21] : memref<1x4x8x8xf32, #tpu.memory_space<vmem>>, vector<1x1x8x8xf32>
    %20 = vector.shape_cast %19 : vector<1x1x8x8xf32> to vector<8x8xf32>
    %21 = vector.shape_cast %18 : vector<8x8xf32> to vector<1x1x8x8xf32>
    tpu.vector_store %arg5[%c0_18, %c1_19, %c0_20, %c0_21], %21 {strides = array<i32>} : memref<1x4x8x8xf32, #tpu.memory_space<vmem>>, vector<1x1x8x8xf32>,
    %c2 = arith.constant 2 : index
    %c0_22 = arith.constant 0 : index
    %c0_23 = arith.constant 0 : index
    %22 = vector.load %arg3[%c2, %c0_22, %c0_23] : memref<4x32x8xf32, #tpu.memory_space<vmem>>, vector<1x32x8xf32>
    %23 = vector.shape_cast %22 : vector<1x32x8xf32> to vector<32x8xf32>
    %cst_24 = arith.constant dense<0.000000e+00> : vector<8x8xf32>
    %24 = tpu.matmul %1, %23, %cst_24 {dimension_numbers = #tpu.dot_dimension_numbers<[1], [0], [0], [1], [0, 0, 1, 1], [], []>} : vector<8x32xf32>, vector<32x8xf32>, vector<8x8xf32> -> vector<8x8xf32>
    %c2_25 = arith.constant 2 : index
    %c0_26 = arith.constant 0 : index
    %c0_27 = arith.constant 0 : index
    %25 = vector.load %arg4[%c2_25, %c0_26, %c0_27] : memref<4x1x8xf32, #tpu.memory_space<vmem>>, vector<1x1x8xf32>
    %26 = vector.shape_cast %25 : vector<1x1x8xf32> to vector<1x8xf32>
    %27 = vector.broadcast %26 : vector<1x8xf32> to vector<8x8xf32>
    %28 = arith.addf %24, %27 : vector<8x8xf32>
    %c0_28 = arith.constant 0 : index
    %c2_29 = arith.constant 2 : index
    %c0_30 = arith.constant 0 : index
    %c0_31 = arith.constant 0 : index
    %29 = vector.load %arg5[%c0_28, %c2_29, %c0_30, %c0_31] : memref<1x4x8x8xf32, #tpu.memory_space<vmem>>, vector<1x1x8x8xf32>
    %30 = vector.shape_cast %29 : vector<1x1x8x8xf32> to vector<8x8xf32>
    %31 = vector.shape_cast %28 : vector<8x8xf32> to vector<1x1x8x8xf32>
    tpu.vector_store %arg5[%c0_28, %c2_29, %c0_30, %c0_31], %31 {strides = array<i32>} : memref<1x4x8x8xf32, #tpu.memory_space<vmem>>, vector<1x1x8x8xf32>,
    %c3 = arith.constant 3 : index
    %c0_32 = arith.constant 0 : index
    %c0_33 = arith.constant 0 : index
    %32 = vector.load %arg3[%c3, %c0_32, %c0_33] : memref<4x32x8xf32, #tpu.memory_space<vmem>>, vector<1x32x8xf32>
    %33 = vector.shape_cast %32 : vector<1x32x8xf32> to vector<32x8xf32>
    %cst_34 = arith.constant dense<0.000000e+00> : vector<8x8xf32>
    %34 = tpu.matmul %1, %33, %cst_34 {dimension_numbers = #tpu.dot_dimension_numbers<[1], [0], [0], [1], [0, 0, 1, 1], [], []>} : vector<8x32xf32>, vector<32x8xf32>, vector<8x8xf32> -> vector<8x8xf32>
    %c3_35 = arith.constant 3 : index
    %c0_36 = arith.constant 0 : index
    %c0_37 = arith.constant 0 : index
    %35 = vector.load %arg4[%c3_35, %c0_36, %c0_37] : memref<4x1x8xf32, #tpu.memory_space<vmem>>, vector<1x1x8xf32>
    %36 = vector.shape_cast %35 : vector<1x1x8xf32> to vector<1x8xf32>
    %37 = vector.broadcast %36 : vector<1x8xf32> to vector<8x8xf32>
    %38 = arith.addf %34, %37 : vector<8x8xf32>
    %c0_38 = arith.constant 0 : index
    %c3_39 = arith.constant 3 : index
    %c0_40 = arith.constant 0 : index
    %c0_41 = arith.constant 0 : index
    %39 = vector.load %arg5[%c0_38, %c3_39, %c0_40, %c0_41] : memref<1x4x8x8xf32, #tpu.memory_space<vmem>>, vector<1x1x8x8xf32>
    %40 = vector.shape_cast %39 : vector<1x1x8x8xf32> to vector<8x8xf32>
    %41 = vector.shape_cast %38 : vector<8x8xf32> to vector<1x1x8x8xf32>
    tpu.vector_store %arg5[%c0_38, %c3_39, %c0_40, %c0_41], %41 {strides = array<i32>} : memref<1x4x8x8xf32, #tpu.memory_space<vmem>>, vector<1x1x8x8xf32>,
    return
  }
  func.func @transform_0(%arg0: i32, %arg1: i32) -> (i32, i32, i32) {
    %c0_i32 = arith.constant 0 : i32
    %c0_i32_0 = arith.constant 0 : i32
    return %arg0, %arg1, %c0_i32 : i32, i32, i32
  }
  func.func @transform_1(%arg0: i32, %arg1: i32) -> (i32, i32, i32) {
    %c0_i32 = arith.constant 0 : i32
    %c0_i32_0 = arith.constant 0 : i32
    %c0_i32_1 = arith.constant 0 : i32
    %c0_i32_2 = arith.constant 0 : i32
    return %c0_i32, %c0_i32_0, %c0_i32_1 : i32, i32, i32
  }
  func.func @transform_2(%arg0: i32, %arg1: i32) -> (i32, i32, i32) {
    %c0_i32 = arith.constant 0 : i32
    %c0_i32_0 = arith.constant 0 : i32
    %c0_i32_1 = arith.constant 0 : i32
    %c0_i32_2 = arith.constant 0 : i32
    return %c0_i32, %c0_i32_0, %c0_i32_1 : i32, i32, i32
  }
  func.func @transform_3(%arg0: i32, %arg1: i32) -> (i32, i32, i32, i32) {
    %c0_i32 = arith.constant 0 : i32
    %c0_i32_0 = arith.constant 0 : i32
    %c0_i32_1 = arith.constant 0 : i32
    return %arg0, %c0_i32, %arg1, %c0_i32_0 : i32, i32, i32, i32
  }
}

module attributes {stable_mosaic.version = 11 : i64} {
  func.func @_attention_kernel(%arg0: i32, %arg1: i32, %arg2: i32, %arg3: memref<1x1x8x8xf32, #tpu.memory_space<vmem>>, %arg4: memref<1x1x8x8xf32, #tpu.memory_space<vmem>>, %arg5: memref<1x1x8x8xf32, #tpu.memory_space<vmem>>, %arg6: memref<1x1x8x8xf32, #tpu.memory_space<vmem>>, %arg7: memref<1x1x8x8xf32, #tpu.memory_space<vmem>>) attributes {dimension_semantics = [#tpu.dimension_semantics<parallel>, #tpu.dimension_semantics<parallel>, #tpu.dimension_semantics<parallel>], iteration_bounds = array<i64: 2, 4, 1>, scalar_prefetch = 0 : i64, scratch_operands = 0 : i64, tpu.core_type = #tpu.core_type<tc>, window_params = [{transform_indices = @transform_0, window_bounds = array<i64: 1, 1, 8, 8>}, {transform_indices = @transform_1, window_bounds = array<i64: 1, 1, 8, 8>}, {transform_indices = @transform_2, window_bounds = array<i64: 1, 1, 8, 8>}, {transform_indices = @transform_3, window_bounds = array<i64: 1, 1, 8, 8>}, {transform_indices = @transform_4, window_bounds = array<i64: 1, 1, 8, 8>}]} {
    %c0 = arith.constant 0 : index
    %c0_0 = arith.constant 0 : index
    %c0_1 = arith.constant 0 : index
    %c0_2 = arith.constant 0 : index
    %0 = vector.load %arg3[%c0, %c0_0, %c0_1, %c0_2] : memref<1x1x8x8xf32, #tpu.memory_space<vmem>>, vector<1x1x8x8xf32>
    %1 = vector.shape_cast %0 : vector<1x1x8x8xf32> to vector<8x8xf32>
    %cst = arith.constant 0.353553385 : f32
    %2 = vector.broadcast %cst : f32 to vector<8x8xf32>
    %3 = arith.mulf %1, %2 : vector<8x8xf32>
    %c0_3 = arith.constant 0 : index
    %c0_4 = arith.constant 0 : index
    %c0_5 = arith.constant 0 : index
    %c0_6 = arith.constant 0 : index
    %4 = vector.load %arg4[%c0_3, %c0_4, %c0_5, %c0_6] : memref<1x1x8x8xf32, #tpu.memory_space<vmem>>, vector<1x1x8x8xf32>
    %5 = vector.shape_cast %4 : vector<1x1x8x8xf32> to vector<8x8xf32>
    %c0_7 = arith.constant 0 : index
    %c0_8 = arith.constant 0 : index
    %c0_9 = arith.constant 0 : index
    %c0_10 = arith.constant 0 : index
    %6 = vector.load %arg5[%c0_7, %c0_8, %c0_9, %c0_10] : memref<1x1x8x8xf32, #tpu.memory_space<vmem>>, vector<1x1x8x8xf32>
    %7 = vector.shape_cast %6 : vector<1x1x8x8xf32> to vector<8x8xf32>
    %cst_11 = arith.constant dense<0.000000e+00> : vector<8x8xf32>
    %8 = tpu.matmul %3, %5, %cst_11 {dimension_numbers = #tpu.dot_dimension_numbers<[1], [1], [0], [0], [0, 0, 1, 0], [], []>} : vector<8x8xf32>, vector<8x8xf32>, vector<8x8xf32> -> vector<8x8xf32>
    %c8_i32 = arith.constant 8 : i32
    %9 = arith.muli %arg2, %c8_i32 : i32
    %10 = tpu.iota {dimensions = array<i32: 0>} : vector<8x8xi32>
    %11 = vector.broadcast %9 : i32 to vector<8x8xi32>
    %12 = arith.addi %11, %10 : vector<8x8xi32>
    %13 = tpu.iota {dimensions = array<i32: 1>} : vector<8x8xi32>
    %14 = arith.cmpi sgt, %13, %12 : vector<8x8xi32>
    %cst_12 = arith.constant 0xFF800000 : f32
    %15 = vector.broadcast %cst_12 : f32 to vector<8x8xf32>
    %16 = arith.select %14, %15, %8 : vector<8x8xi1>, vector<8x8xf32>
    %cst_13 = arith.constant dense<0xFF800000> : vector<8xf32>
    %17 = vector.multi_reduction <maximumf>, %16, %cst_13 [1] : vector<8x8xf32> to vector<8xf32>
    %18 = vector.shape_cast %17 : vector<8xf32> to vector<8x1xf32>
    %19 = vector.broadcast %18 : vector<8x1xf32> to vector<8x8xf32>
    %20 = arith.subf %16, %19 : vector<8x8xf32>
    %21 = math.exp %20 : vector<8x8xf32>
    %cst_14 = arith.constant dense<0.000000e+00> : vector<8xf32>
    %22 = vector.multi_reduction <add>, %21, %cst_14 [1] : vector<8x8xf32> to vector<8xf32>
    %23 = vector.shape_cast %22 : vector<8xf32> to vector<8x1xf32>
    %24 = tpu.reciprocal %23 {approx = true} : vector<8x1xf32> -> vector<8x1xf32>
    %25 = arith.mulf %23, %24 : vector<8x1xf32>
    %cst_15 = arith.constant 2.000000e+00 : f32
    %26 = vector.broadcast %cst_15 : f32 to vector<8x1xf32>
    %27 = arith.subf %26, %25 : vector<8x1xf32>
    %28 = arith.mulf %24, %27 : vector<8x1xf32>
    %29 = vector.broadcast %28 : vector<8x1xf32> to vector<8x8xf32>
    %30 = arith.mulf %21, %29 : vector<8x8xf32>
    %c0_16 = arith.constant 0 : index
    %c0_17 = arith.constant 0 : index
    %c0_18 = arith.constant 0 : index
    %c0_19 = arith.constant 0 : index
    %31 = vector.load %arg7[%c0_16, %c0_17, %c0_18, %c0_19] : memref<1x1x8x8xf32, #tpu.memory_space<vmem>>, vector<1x1x8x8xf32>
    %32 = vector.shape_cast %31 : vector<1x1x8x8xf32> to vector<8x8xf32>
    %33 = vector.shape_cast %30 : vector<8x8xf32> to vector<1x1x8x8xf32>
    tpu.vector_store %arg7[%c0_16, %c0_17, %c0_18, %c0_19], %33 {strides = array<i32>} : memref<1x1x8x8xf32, #tpu.memory_space<vmem>>, vector<1x1x8x8xf32>,
    %cst_20 = arith.constant dense<0.000000e+00> : vector<8x8xf32>
    %34 = tpu.matmul %30, %7, %cst_20 {dimension_numbers = #tpu.dot_dimension_numbers<[1], [0], [0], [1], [0, 0, 1, 1], [], []>} : vector<8x8xf32>, vector<8x8xf32>, vector<8x8xf32> -> vector<8x8xf32>
    %c0_21 = arith.constant 0 : index
    %c0_22 = arith.constant 0 : index
    %c0_23 = arith.constant 0 : index
    %c0_24 = arith.constant 0 : index
    %35 = vector.load %arg6[%c0_21, %c0_22, %c0_23, %c0_24] : memref<1x1x8x8xf32, #tpu.memory_space<vmem>>, vector<1x1x8x8xf32>
    %36 = vector.shape_cast %35 : vector<1x1x8x8xf32> to vector<8x8xf32>
    %37 = vector.shape_cast %34 : vector<8x8xf32> to vector<1x1x8x8xf32>
    tpu.vector_store %arg6[%c0_21, %c0_22, %c0_23, %c0_24], %37 {strides = array<i32>} : memref<1x1x8x8xf32, #tpu.memory_space<vmem>>, vector<1x1x8x8xf32>,
    return
  }
  func.func @transform_0(%arg0: i32, %arg1: i32, %arg2: i32) -> (i32, i32, i32, i32) {
    %c0_i32 = arith.constant 0 : i32
    %c0_i32_0 = arith.constant 0 : i32
    return %arg0, %arg1, %arg2, %c0_i32 : i32, i32, i32, i32
  }
  func.func @transform_1(%arg0: i32, %arg1: i32, %arg2: i32) -> (i32, i32, i32, i32) {
    %c0_i32 = arith.constant 0 : i32
    %c0_i32_0 = arith.constant 0 : i32
    %c0_i32_1 = arith.constant 0 : i32
    return %arg0, %arg1, %c0_i32, %c0_i32_0 : i32, i32, i32, i32
  }
  func.func @transform_2(%arg0: i32, %arg1: i32, %arg2: i32) -> (i32, i32, i32, i32) {
    %c0_i32 = arith.constant 0 : i32
    %c0_i32_0 = arith.constant 0 : i32
    %c0_i32_1 = arith.constant 0 : i32
    return %arg0, %arg1, %c0_i32, %c0_i32_0 : i32, i32, i32, i32
  }
  func.func @transform_3(%arg0: i32, %arg1: i32, %arg2: i32) -> (i32, i32, i32, i32) {
    %c0_i32 = arith.constant 0 : i32
    %c0_i32_0 = arith.constant 0 : i32
    return %arg0, %arg1, %arg2, %c0_i32 : i32, i32, i32, i32
  }
  func.func @transform_4(%arg0: i32, %arg1: i32, %arg2: i32) -> (i32, i32, i32, i32) {
    %c0_i32 = arith.constant 0 : i32
    %c0_i32_0 = arith.constant 0 : i32
    return %arg0, %arg1, %arg2, %c0_i32 : i32, i32, i32, i32
  }
}

module attributes {stable_mosaic.version = 11 : i64} {
  func.func @_out_projection_kernel(%arg0: i32, %arg1: i32, %arg2: memref<1x4x8x8xf32, #tpu.memory_space<vmem>>, %arg3: memref<4x8x32xf32, #tpu.memory_space<vmem>>, %arg4: memref<1x32xf32, #tpu.memory_space<vmem>>, %arg5: memref<1x8x32xf32, #tpu.memory_space<vmem>>) attributes {dimension_semantics = [#tpu.dimension_semantics<parallel>, #tpu.dimension_semantics<parallel>], iteration_bounds = array<i64: 2, 1>, scalar_prefetch = 0 : i64, scratch_operands = 0 : i64, tpu.core_type = #tpu.core_type<tc>, window_params = [{transform_indices = @transform_0, window_bounds = array<i64: 1, 4, 8, 8>}, {pipeline_mode = #tpu.pipeline_mode<synchronous>, transform_indices = @transform_1, window_bounds = array<i64: 4, 8, 32>}, {pipeline_mode = #tpu.pipeline_mode<synchronous>, transform_indices = @transform_2, window_bounds = array<i64: 1, 32>}, {transform_indices = @transform_3, window_bounds = array<i64: 1, 8, 32>}]} {
    %cst = arith.constant 0.000000e+00 : f32
    %0 = vector.broadcast %cst : f32 to vector<8x32xf32>
    %c0 = arith.constant 0 : index
    %c0_0 = arith.constant 0 : index
    %c0_1 = arith.constant 0 : index
    %c0_2 = arith.constant 0 : index
    %1 = vector.load %arg2[%c0, %c0_0, %c0_1, %c0_2] : memref<1x4x8x8xf32, #tpu.memory_space<vmem>>, vector<1x1x8x8xf32>
    %2 = vector.shape_cast %1 : vector<1x1x8x8xf32> to vector<8x8xf32>
    %c0_3 = arith.constant 0 : index
    %c0_4 = arith.constant 0 : index
    %c0_5 = arith.constant 0 : index
    %3 = vector.load %arg3[%c0_3, %c0_4, %c0_5] : memref<4x8x32xf32, #tpu.memory_space<vmem>>, vector<1x8x32xf32>
    %4 = vector.shape_cast %3 : vector<1x8x32xf32> to vector<8x32xf32>
    %cst_6 = arith.constant dense<0.000000e+00> : vector<8x32xf32>
    %5 = tpu.matmul %2, %4, %cst_6 {dimension_numbers = #tpu.dot_dimension_numbers<[1], [0], [0], [1], [0, 0, 1, 1], [], []>} : vector<8x8xf32>, vector<8x32xf32>, vector<8x32xf32> -> vector<8x32xf32>
    %6 = arith.addf %0, %5 : vector<8x32xf32>
    %c0_7 = arith.constant 0 : index
    %c1 = arith.constant 1 : index
    %c0_8 = arith.constant 0 : index
    %c0_9 = arith.constant 0 : index
    %7 = vector.load %arg2[%c0_7, %c1, %c0_8, %c0_9] : memref<1x4x8x8xf32, #tpu.memory_space<vmem>>, vector<1x1x8x8xf32>
    %8 = vector.shape_cast %7 : vector<1x1x8x8xf32> to vector<8x8xf32>
    %c1_10 = arith.constant 1 : index
    %c0_11 = arith.constant 0 : index
    %c0_12 = arith.constant 0 : index
    %9 = vector.load %arg3[%c1_10, %c0_11, %c0_12] : memref<4x8x32xf32, #tpu.memory_space<vmem>>, vector<1x8x32xf32>
    %10 = vector.shape_cast %9 : vector<1x8x32xf32> to vector<8x32xf32>
    %cst_13 = arith.constant dense<0.000000e+00> : vector<8x32xf32>
    %11 = tpu.matmul %8, %10, %cst_13 {dimension_numbers = #tpu.dot_dimension_numbers<[1], [0], [0], [1], [0, 0, 1, 1], [], []>} : vector<8x8xf32>, vector<8x32xf32>, vector<8x32xf32> -> vector<8x32xf32>
    %12 = arith.addf %6, %11 : vector<8x32xf32>
    %c0_14 = arith.constant 0 : index
    %c2 = arith.constant 2 : index
    %c0_15 = arith.constant 0 : index
    %c0_16 = arith.constant 0 : index
    %13 = vector.load %arg2[%c0_14, %c2, %c0_15, %c0_16] : memref<1x4x8x8xf32, #tpu.memory_space<vmem>>, vector<1x1x8x8xf32>
    %14 = vector.shape_cast %13 : vector<1x1x8x8xf32> to vector<8x8xf32>
    %c2_17 = arith.constant 2 : index
    %c0_18 = arith.constant 0 : index
    %c0_19 = arith.constant 0 : index
    %15 = vector.load %arg3[%c2_17, %c0_18, %c0_19] : memref<4x8x32xf32, #tpu.memory_space<vmem>>, vector<1x8x32xf32>
    %16 = vector.shape_cast %15 : vector<1x8x32xf32> to vector<8x32xf32>
    %cst_20 = arith.constant dense<0.000000e+00> : vector<8x32xf32>
    %17 = tpu.matmul %14, %16, %cst_20 {dimension_numbers = #tpu.dot_dimension_numbers<[1], [0], [0], [1], [0, 0, 1, 1], [], []>} : vector<8x8xf32>, vector<8x32xf32>, vector<8x32xf32> -> vector<8x32xf32>
    %18 = arith.addf %12, %17 : vector<8x32xf32>
    %c0_21 = arith.constant 0 : index
    %c3 = arith.constant 3 : index
    %c0_22 = arith.constant 0 : index
    %c0_23 = arith.constant 0 : index
    %19 = vector.load %arg2[%c0_21, %c3, %c0_22, %c0_23] : memref<1x4x8x8xf32, #tpu.memory_space<vmem>>, vector<1x1x8x8xf32>
    %20 = vector.shape_cast %19 : vector<1x1x8x8xf32> to vector<8x8xf32>
    %c3_24 = arith.constant 3 : index
    %c0_25 = arith.constant 0 : index
    %c0_26 = arith.constant 0 : index
    %21 = vector.load %arg3[%c3_24, %c0_25, %c0_26] : memref<4x8x32xf32, #tpu.memory_space<vmem>>, vector<1x8x32xf32>
    %22 = vector.shape_cast %21 : vector<1x8x32xf32> to vector<8x32xf32>
    %cst_27 = arith.constant dense<0.000000e+00> : vector<8x32xf32>
    %23 = tpu.matmul %20, %22, %cst_27 {dimension_numbers = #tpu.dot_dimension_numbers<[1], [0], [0], [1], [0, 0, 1, 1], [], []>} : vector<8x8xf32>, vector<8x32xf32>, vector<8x32xf32> -> vector<8x32xf32>
    %24 = arith.addf %18, %23 : vector<8x32xf32>
    %c0_28 = arith.constant 0 : index
    %c0_29 = arith.constant 0 : index
    %25 = vector.load %arg4[%c0_28, %c0_29] : memref<1x32xf32, #tpu.memory_space<vmem>>, vector<1x32xf32>
    %26 = vector.broadcast %25 : vector<1x32xf32> to vector<8x32xf32>
    %27 = arith.addf %24, %26 : vector<8x32xf32>
    %c0_30 = arith.constant 0 : index
    %c0_31 = arith.constant 0 : index
    %c0_32 = arith.constant 0 : index
    %28 = vector.load %arg5[%c0_30, %c0_31, %c0_32] : memref<1x8x32xf32, #tpu.memory_space<vmem>>, vector<1x8x32xf32>
    %29 = vector.shape_cast %28 : vector<1x8x32xf32> to vector<8x32xf32>
    %30 = vector.shape_cast %27 : vector<8x32xf32> to vector<1x8x32xf32>
    tpu.vector_store %arg5[%c0_30, %c0_31, %c0_32], %30 {strides = array<i32>} : memref<1x8x32xf32, #tpu.memory_space<vmem>>, vector<1x8x32xf32>,
    return
  }
  func.func @transform_0(%arg0: i32, %arg1: i32) -> (i32, i32, i32, i32) {
    %c0_i32 = arith.constant 0 : i32
    %c0_i32_0 = arith.constant 0 : i32
    %c0_i32_1 = arith.constant 0 : i32
    return %arg0, %c0_i32, %arg1, %c0_i32_0 : i32, i32, i32, i32
  }
  func.func @transform_1(%arg0: i32, %arg1: i32) -> (i32, i32, i32) {
    %c0_i32 = arith.constant 0 : i32
    %c0_i32_0 = arith.constant 0 : i32
    %c0_i32_1 = arith.constant 0 : i32
    %c0_i32_2 = arith.constant 0 : i32
    return %c0_i32, %c0_i32_0, %c0_i32_1 : i32, i32, i32
  }
  func.func @transform_2(%arg0: i32, %arg1: i32) -> (i32, i32) {
    %c0_i32 = arith.constant 0 : i32
    %c0_i32_0 = arith.constant 0 : i32
    %c0_i32_1 = arith.constant 0 : i32
    return %c0_i32, %c0_i32_0 : i32, i32
  }
  func.func @transform_3(%arg0: i32, %arg1: i32) -> (i32, i32, i32) {
    %c0_i32 = arith.constant 0 : i32
    %c0_i32_0 = arith.constant 0 : i32
    return %arg0, %arg1, %c0_i32 : i32, i32, i32
  }
}

</mosaic_0001>

<bundles_post_ra>
// kernel: self_attention_forward.6
= control target key start
LH: loop header
LB: loop body
LE: loop exit
PB: predicated region body
PF: predicated region fallthrough
CT: control target
= control target key end

     0   :  { %s821_s12 = smov 0   ;;  %s823_s13 = smov 0   ;;  %s934_s0 = inlined_call_operand.vmem [shape: f32[2,8,32], index: 0, kind: input, shape index: {}]   ;;  %s935_s1 = inlined_call_operand.vmem [shape: f32[4,32,8], index: 1, kind: input, shape index: {}]   ;;  %s936_s2 = inlined_call_operand.vmem [shape: f32[4,1,8], index: 2, kind: input, shape index: {}]   ;;  %s937_s3 = inlined_call_operand.vmem [shape: f32[2,4,8,8], index: 3, kind: output, shape index: {}]  }
   0x1   :  { %s825_s14 = smov 0  }
   0x2 LB: > { %s25_s15 = sadd.s32 1, %s792_s13  ;;  %p626_p0 = scmp.ge.s32.totalorder %s796_s14, 1  ;;  %s796_s14 = sphi %s825_s14, %s13_s14   ;;  %s792_s13 = sphi %s823_s13, %s939_s13   ;;  %s788_s12 = sphi %s821_s12, %s938_s12  }
   0x3   : > { %p27_p1 = scmp.ge.s32.totalorder %s25_s15, 2  ;;  %p155_p2 = scmp.lt.s32.totalorder %s796_s14, 3 }
   0x5   : > { %s941_s15 = smov (%p27_p1, %s25_s15), 0  ;;  %p156_p3 = pnand %p626_p0, %p155_p2 }
   0x6   : > { %v200_v0 = vld [vmem:[%s935_s1] sm:$0xff] (!%p156_p3)  ;;  %v201_v1 = vld [vmem:[%s935_s1 + $0x8] sm:$0xff] (!%p156_p3)  ;;  %v798_v3 = vmov (!%p156_p3), 0.0|0.0   ;;  %v202_v6 = vld [vmem:[%s935_s1 + $0x10] sm:$0xff] (!%p156_p3)  ;;  %p184_p4 = scmp.lt.s32.totalorder (!%p156_p3), %s788_s12, 1  ;;  %vm799_vm0 = vmmov (!%p156_p3), 0  }
   0x7   : > { %159 = sbr.rel (%p156_p3) target bundleno = 241 (0xf1), region = 32  ;;  %v632_v2 = vld [vmem:[%s935_s1 + $0x20] sm:$0xff] (!%p156_p3)  ;;  %723 = vmatprep.subr.bf16.mxu0 (!%p156_p3), %v798_v3  ;;  %729 = vmatprep.subr.bf16.mxu1 (!%p156_p3), %v798_v3  ;;  %v724_v4 = vpack.c.bf16 (!%p156_p3), %v201_v1, %v200_v0  ;;  %v633_v5 = vld [vmem:[%s935_s1 + $0x28] sm:$0xff] (!%p156_p3)  ;;  %v203_v7 = vld [vmem:[%s935_s1 + $0x18] sm:$0xff] (!%p156_p3)  ;;  %v800_v11 = vmov (!%p156_p3), 0.0   ;;  %vm211_vm1 = vcmask (!%p156_p3), 261120  }
   0x8   : > { %v730_v8 = vpack.c.bf16 (!%p156_p3), %v633_v5, %v632_v2  ;;  %v634_v9 = vld [vmem:[%s935_s1 + $0x30] sm:$0xff] (!%p156_p3)  ;;  %v635_v10 = vld [vmem:[%s935_s1 + $0x38] sm:$0xff] (!%p156_p3)  ;;  %687 = vmatprep.mubr.msk.f32.mxu0 (!%p156_p3), %vm799_vm0, %v800_v11  ;;  %698 = vmatprep.mubr.msk.f32.mxu1 (!%p156_p3), %vm799_vm0, %v800_v11  ;;  %v727_v12 = vpack.c.bf16 (!%p156_p3), %v203_v7, %v202_v6  ;;  %v640_v14 = vld [vmem:[%s935_s1 + $0x40] sm:$0xff] (!%p156_p3)  ;;  %vm285_vm2 = vcmask (!%p156_p3), 64512  }
   0x9   : > { %725 = vmatpush3.bf16.msra.mxu0 (!%p156_p3), %v724_v4  ;;  %v733_v13 = vpack.c.bf16 (!%p156_p3), %v635_v10, %v634_v9  ;;  %v641_v15 = vld [vmem:[%s935_s1 + $0x48] sm:$0xff] (!%p156_p3)  ;;  %v648_v16 = vld [vmem:[%s935_s1 + $0x60] sm:$0xff] (!%p156_p3)  ;;  %v642_v21 = vld [vmem:[%s935_s1 + $0x50] sm:$0xff] (!%p156_p3) }
   0xa   : > { %731 = vmatpush3.bf16.msra.mxu1 (!%p156_p3), %v730_v8  ;;  %726 = vmatprep.subr.bf16.mxu0 (!%p156_p3), %v798_v3  ;;  %v649_v17 = vld [vmem:[%s935_s1 + $0x68] sm:$0xff] (!%p156_p3)  ;;  %v736_v19 = vpack.c.bf16 (!%p156_p3), %v641_v15, %v640_v14  ;;  %v643_v22 = vld [vmem:[%s935_s1 + $0x58] sm:$0xff] (!%p156_p3)  ;;  %v650_v23 = vld [vmem:[%s935_s1 + $0x70] sm:$0xff] (!%p156_p3) }
   0xb   : > { %732 = vmatprep.subr.bf16.mxu1 (!%p156_p3), %v798_v3  ;;  %v742_v20 = vpack.c.bf16 (!%p156_p3), %v649_v17, %v648_v16  ;;  %v651_v24 = vld [vmem:[%s935_s1 + $0x78] sm:$0xff] (!%p156_p3)  ;;  %v739_v25 = vpack.c.bf16 (!%p156_p3), %v643_v22, %v642_v21  ;;  %v630_v27 = vld [vmem:[%s936_s2] ss:$0 sm:$0xff] (!%p156_p3)  ;;  %v637_v28 = vld [vmem:[%s936_s2 + $0x1] ss:$0 sm:$0xff] (!%p156_p3) }
   0xc   : > { %v745_v26 = vpack.c.bf16 (!%p156_p3), %v651_v24, %v650_v23  ;;  %v645_v35 = vld [vmem:[%s936_s2 + $0x2] ss:$0 sm:$0xff] (!%p156_p3)  ;;  %v653_v36 = vld [vmem:[%s936_s2 + $0x3] ss:$0 sm:$0xff] (!%p156_p3) }
   0xd   : > { %728 = vmatpush3.bf16.msra.mxu0 (!%p156_p3), %v727_v12 }
   0xe   : > { %s943_s12 = smov (!%p184_p4, %s788_s12), 1  ;;  %734 = vmatpush3.bf16.msra.mxu1 %v733_v13  ;;  %735 = vmatprep.subr.bf16.mxu0 %v798_v3 }
   0xf   : > { %s627_s9 = sshll.u32 %s943_s12, 3  ;;  %741 = vmatprep.subr.bf16.mxu1 %v798_v3  ;;  %s658_s29 = sshll.u32 %s943_s12, 5 }
  0x10   : > { %s190_s20 = scalar_lea.vmem %s934_s0, %s627_s9  ;;  %s198_s9 = scalar_lea.vmem %s937_s3, %s658_s29 }
  0x11   : > { %v199_v18 = vld [vmem:[%s190_s20] sm:$0xff] }
  0x12   : > { %688 = vmatmul.mubr.msk.f32.vlgmr.msra.gmra.mrb[0].mxu0 %vm211_vm1, %v199_v18  ;;  %699 = vmatmul.mubr.msk.f32.vlgmr.msra.gmra.mrb[0].mxu1 %vm211_vm1, %v199_v18 }
  0x13   : > { %737 = vmatpush3.bf16.msra.mxu0 %v736_v19  ;;  %743 = vmatpush3.bf16.msra.mxu1 %v742_v20 }
  0x14   : > { %738 = vmatprep.subr.bf16.mxu0 %v798_v3  ;;  %744 = vmatprep.subr.bf16.mxu1 %v798_v3 }
  0x15   : > { %709 = vmatprep.mubr.msk.f32.mxu0 %vm799_vm0, %v800_v11  ;;  %720 = vmatprep.mubr.msk.f32.mxu1 %vm799_vm0, %v800_v11 }
  0x17   : > { %740 = vmatpush3.bf16.msra.mxu0 %v739_v25  ;;  %746 = vmatpush3.bf16.msra.mxu1 %v745_v26 }
  0x1a   : > { %710 = vmatmul.mubr.msk.f32.vlgmr.msra.gmra.mrb[2].mxu0 %vm211_vm1, %v199_v18  ;;  %721 = vmatmul.mubr.msk.f32.vlgmr.msra.gmra.mrb[2].mxu1 %vm211_vm1, %v199_v18 }
  0xe5   : > { %v281_v29 = vpop.f32.mrb[0].mxu0  ;;  %v366_v31 = vpop.f32.mrb[0].mxu1 }
  0xe6   : > { %v282_v30 = vadd.f32 %v630_v27, %v281_v29  ;;  %v689_v32 = vpop.f32.mrb[1].mxu0  ;;  %v367_v33 = vadd.f32 %v637_v28, %v366_v31  ;;  %v700_v34 = vpop.f32.mrb[1].mxu1 }
  0xe8   : > { %286 = vst.msk [vmem:[%s198_s9] sm:$0xff] %vm285_vm2, %v282_v30  ;;  %639 = vst.msk [vmem:[%s198_s9 + $0x8] sm:$0xff] %vm285_vm2, %v367_v33 }
  0xed   : > { %v451_v37 = vpop.f32.mrb[2].mxu0  ;;  %v536_v39 = vpop.f32.mrb[2].mxu1 }
  0xee   : > { %v452_v38 = vadd.f32 %v645_v35, %v451_v37  ;;  %v711_v40 = vpop.f32.mrb[3].mxu0  ;;  %v537_v41 = vadd.f32 %v653_v36, %v536_v39  ;;  %v722_v42 = vpop.f32.mrb[3].mxu1 }
  0xf0   : > { %647 = vst.msk [vmem:[%s198_s9 + $0x10] sm:$0xff] %vm285_vm2, %v452_v38  ;;  %655 = vst.msk [vmem:[%s198_s9 + $0x18] sm:$0xff] %vm285_vm2, %v537_v41 }
  0xf1 PF: > { %s13_s14 = sadd.s32 1, %s796_s14   ;;  %s938_s12 = smov %s792_s13 }
  0xf2   : > { %p10_p5 = scmp.ge.s32.totalorder %s13_s14, 4   ;;  %s939_s13 = smov %s941_s15 }
  0xf4   :  { %12 = sbr.rel (!%p10_p5) target bundleno = 2 (0x2), region = 71 }

// kernel: self_attention_forward.8
= control target key start
LH: loop header
LB: loop body
LE: loop exit
PB: predicated region body
PF: predicated region fallthrough
CT: control target
= control target key end

     0   :  { %s1096_s0 = inlined_call_operand.vmem [shape: f32[2,4,8,8], index: 0, kind: input, shape index: {}]   ;;  %s1097_s1 = inlined_call_operand.vmem [shape: f32[2,4,8,8], index: 1, kind: input, shape index: {}]   ;;  %s1098_s2 = inlined_call_operand.vmem [shape: f32[2,4,8,8], index: 2, kind: input, shape index: {}]   ;;  %s1099_s3 = inlined_call_operand.vmem [shape: f32[2,4,8,8], index: 3, kind: output, shape index: {0}]   ;;  %s1100_s4 = inlined_call_operand.hbm [shape: f32[2,4,8,8], index: 4, kind: output, shape index: {1}]  }
   0x1   :  { %1101 = sst [smem:[#allocation5_spill]] %s1096_s0 }
   0x2   :  { %1102 = sst [smem:[#allocation6_spill]] %s1097_s1 }
   0x3   :  { %10 = vsyncpa [#allocation3], 0 }
   0x4   :  { %12 = vsyncpa [#allocation3 + $0x1], 0  ;;  %s943_s15 = smov 0   ;;  %s945_s16 = smov 0  }
   0x5   :  { %s947_s17 = smov 0   ;;  %s949_s18 = smov 0  }
   0x6   :  { %s951_s19 = smov 0   ;;  %s953_s20 = smov 0  }
   0x7   :  { %s955_s21 = smov 0   ;;  %s957_s22 = smov 0  }
   0x8 LB: > { %s706_s23 = sadd.s32 4294967295, %s913_s22   ;;  %s707_s24 = sadd.s32 4294967294, %s913_s22   ;;  %s913_s22 = sphi %s957_s22, %s18_s22   ;;  %s909_s21 = sphi %s955_s21, %s1113_s21   ;;  %s905_s20 = sphi %s953_s20, %s1112_s20   ;;  %s901_s19 = sphi %s951_s19, %s1111_s19   ;;  %s897_s18 = sphi %s949_s18, %s1110_s18   ;;  %s893_s17 = sphi %s947_s17, %s1109_s17   ;;  %s889_s16 = sphi %s945_s16, %s1108_s16   ;;  %s885_s15 = sphi %s943_s15, %s1107_s15  }
   0x9   : > { %s33_s25 = sadd.s32 1, %s905_s20  ;;  %s37_s26 = sadd.s32 1, %s909_s21 }
   0xa   : > { %p35_p0 = scmp.ge.s32.totalorder %s33_s25, 4  ;;  %p174_p1 = scmp.ne.s32.totalorder %s893_s17, %s889_s16 }
   0xb   : > { %p175_p2 = scmp.eq.s32.totalorder %s706_s23, 7  ;;  %p180_p5 = scmp.ne.s32.totalorder %s889_s16, %s885_s15 }
   0xc   : > { %s1115_s25 = smov (%p35_p0, %s33_s25), 0  ;;  %s1117_s26 = smov (!%p35_p0, %s37_s26), %s909_s21 }
   0xd   : > { %s158_s27 = ssub.s32 %s905_s20, %s1115_s25  ;;  %p994_p3 = por %p175_p2, %p174_p1 }
   0xe   : > { %p39_p4 = scmp.ge.s32.totalorder %s1117_s26, 2  ;;  %p181_p6 = scmp.eq.s32.totalorder %s707_s24, 7 }
   0xf   : > { %p710_p7 = scmp.ge.s32.totalorder %s913_s22, 1  ;;  %p235_p9 = scmp.lt.s32.totalorder %s913_s22, 9 }
  0x10   : > { %s1119_s26 = smov (%p39_p4, %s1117_s26), 0  ;;  %p1003_p8 = por %p181_p6, %p180_p5 }
  0x11   : > { %s157_s30 = ssub.s32 %s909_s21, %s1119_s26  ;;  %s164_s5 = sadd.s32 1, %s893_s17 }
  0x12   : > { %s159_s6 = sor.u32 %s158_s27, %s157_s30  ;;  %p236_p10 = pnand %p710_p7, %p235_p9 }
  0x13   : > { %p162_p11 = scmp.eq.s32.totalorder %s159_s6, 0  ;;  %p294_p12 = scmp.lt.s32.totalorder (!%p236_p10), %s901_s19, 1  ;;  %v915_v0 = vmov (!%p236_p10), 0.0   ;;  %vm916_vm0 = vmmov (!%p236_p10), 0   ;;  %vm336_vm1 = vcmask (!%p236_p10), 64512   ;;  %v414_v4 = vlaneseq (!%p236_p10) }
  0x14   : > { %239 = sbr.rel (%p236_p10) target bundleno = 783 (0x30f), region = 32  ;;  %p296_p13 = scmp.lt.s32.totalorder (!%p236_p10), %s897_s18, 3  ;;  %732 = vmatprep.subr.mxu0 (!%p236_p10), %v915_v0  ;;  %734 = vmatprep.mubr.msk.f32.mxu0 (!%p236_p10), %vm916_vm0, %v915_v0 }
  0x15   : > { %s1012_s7 = scalar_select %p162_p11, %s893_s17, %s164_s5  }
  0x16   : > { %737 = vmatprep.subr.mxu1 (!%p236_p10), %v915_v0  ;;  %739 = vmatprep.mubr.msk.f32.mxu1 (!%p236_p10), %vm916_vm0, %v915_v0  ;;  %s1105_s1 = sld [smem:[#allocation6_spill]] (!%p236_p10)  ;;  %s1106_s0 = sld [smem:[#allocation5_spill]] (!%p236_p10)  ;;  %v415_v5 = vshrl.u32 (!%p236_p10), %v414_v4, 7  ;;  %v419_v6 = vand.u32 (!%p236_p10), 127, %v414_v4 }
  0x17   : > { %s724_s13 = sshll.u32 (!%p236_p10), %s901_s19, 2 }
  0x18   : > { %vm420_vm2 = vcmp.gt.s32.totalorder (!%p236_p10), %v419_v6, %v415_v5  ;;  %s538_s14 = sadd.s32 (!%p236_p10), %s897_s18, %s724_s13 }
  0x1b   : > { %s295_s8 = scalar_select %p294_p12, %s901_s19, 1 }
  0x1c   : > { %s297_s9 = scalar_select %p296_p13, %s897_s18, 3 }
  0x1d   : > { %s712_s10 = sshll.u32 %s295_s8, 2 }
  0x1e   : > { %s302_s11 = sadd.s32 %s712_s10, %s297_s9  ;;  %s291_s9 = sand.u32 1, %s889_s16  }
  0x1f   : > { %s1018_s12 = sshll.u32 %s302_s11, 3  ;;  %s711_s10 = sshll.u32 %s291_s9, 3 }
  0x20   : > { %s312_s23 = scalar_lea.vmem %s1105_s1, %s1018_s12  ;;  %s304_s30 = scalar_lea.vmem %s1106_s0, %s1018_s12 }
  0x21   : > { %v334_v1 = vld [vmem:[%s312_s23] sm:$0xff]  ;;  %s320_s8 = scalar_lea.vmem %s1098_s2, %s1018_s12  ;;  %s293_s11 = scalar_lea.vmem [#allocation2], %s711_s10 }
  0x22   : > { %v332_v2 = vld [vmem:[%s304_s30] sm:$0xff]  ;;  %733 = vmatpush3.xpose.msk.msra.mxu0 %vm336_vm1, %v334_v1  ;;  %s725_s23 = sshll.u32 %s538_s14, 7  ;;  %s542_s24 = sshll.u32 %s293_s11, 4  ;;  %s543_s24 = int_to_ptr.vmem [resolvable:$true] %s542_s24 }
  0x23   : > { %v333_v3 = vmul.f32 0.35355338, %v332_v2  ;;  %v335_v16 = vld [vmem:[%s320_s8] sm:$0xff]  ;;  %s1044_s5 = scalar_lea.hbm %s1100_s4, %s725_s23  ;;  %s523_s6 = scalar_lea.sflag [#allocation3], %s291_s9 }
  0x24   : > { %738 = vmatpush3.msra.mxu1 %v335_v16  ;;  %s819_s8 = scalar_lea.vmem %s543_s24, 128  ;;  %s917_s0 = smov [#allocation2]  }
  0x25   : > { %735 = vmatmul.mubr.msk.f32.vlgmr.msra.gmra.mrb[0].mxu0 %vm336_vm1, %v333_v3  ;;  %p820_p0 = scmp.ne.s32.totalorder %s543_s24, %s819_s8  ;;  %s823_s10 = sshll.u32 %s917_s0, 4  ;;  %s824_s10 = int_to_ptr.vmem [resolvable:$false] %s823_s10 }
  0x26   : > { %s825_s1 = scalar_lea.vmem %s824_s10, 256  ;;  %p826_p4 = scmp.lt.s32.totalorder %s543_s24, %s824_s10 }
  0x27   : > { %p821_p1 = pnand %p820_p0, %p994_p3  ;;  %p827_p5 = scmp.lt.s32.totalorder %s825_s1, %s819_s8 }
  0x29   : > { %p822_p2 = pneg %p821_p1  ;;  %p828_p6 = por %p827_p5, %p826_p4 }
  0x2b   : > { %p829_p7 = pnand %p828_p6, %p822_p2 }
  0xf8   : > { %v409_v7 = vpop.f32.mrb[0].mxu0 }
  0xf9   : > { %v421_v8 = vsel %vm420_vm2, -inf, %v409_v7  ;;  %v736_v9 = vpop.f32.mrb[1].mxu0 }
  0xfa   : > { %v422_v10 = vsel %vm336_vm1, %v421_v8, -inf }
  0xfb   : > { %423 = vmax.xlane.f32.xlu0 %v422_v10 }
 0x188   : > { %v424_v11 = vpop.xlane.xlu0 %423 }
 0x189   : > { %v425_v12 = vsub.f32 %v421_v8, %v424_v11 }
 0x18b   : > { %v426_v13 = vmul.f32 1.442695, %v425_v12 }
 0x18d   : > { %815 = vpow2.f32 %v426_v13 }
 0x197   : > { %v816_v14 = vpop.eup %815 }
 0x198   : > { %v428_v15 = vsel %vm336_vm1, %v816_v14, 0.0 }
 0x199   : > { %429 = vadd.xlane.f32.xlu0 %v428_v15 }
 0x226   : > { %v430_v17 = vpop.xlane.xlu0 %429 }
 0x227   : > { %817 = vrcp.f32 %v430_v17 }
 0x231   : > { %v818_v18 = vpop.eup %817 }
 0x232   : > { %v432_v19 = vmul.f32 %v818_v18, %v430_v17 }
 0x234   : > { %v433_v20 = vsub.f32 2.0, %v432_v19 }
 0x236   : > { %v434_v21 = vmul.f32 %v818_v18, %v433_v20 }
 0x238   : > { %v435_v22 = vmul.f32 %v816_v14, %v434_v21 }
 0x23a   : > { %740 = vmatmul.mubr.msk.f32.vlgmr.msra.gmra.mrb[0].mxu1 %vm336_vm1, %v435_v22  ;;  %436 = vst.msk [vmem:[%s293_s11] sm:$0xff] %vm336_vm1, %v435_v22 }
 0x23b   : > { %832 = shalt.err (!%p829_p7)
}
 0x23c   : > { %s833_s18 = scalar_lea.hbm %s1044_s5, 128  ;;  %s837_s0 = scalar_lea.hbm %s1100_s4, 1024 }
 0x23d   : > { %p834_p9 = scmp.ne.s32.totalorder %s1044_s5, %s833_s18  ;;  %p838_p12 = scmp.lt.u32.totalorder %s1044_s5, %s1100_s4 }
 0x23e   : > { %p839_p13 = scmp.lt.u32.totalorder %s837_s0, %s833_s18  ;;  %p841_p1 = scmp.lt.u32.totalorder %s833_s18, %s1044_s5 }
 0x23f   : > { %p835_p10 = pnand %p834_p9, %p994_p3 }
 0x240   : > { %p840_p0 = por %p839_p13, %p838_p12 }
 0x241   : > { %p836_p11 = pneg %p835_p10 }
 0x242   : > { %p842_p2 = por %p841_p1, %p840_p0 }
 0x244   : > { %p843_p4 = pnand %p842_p2, %p836_p11 }
 0x246   : > { %846 = shalt.err (!%p843_p4)
}
 0x247   : > { %742 = dma.vmem_to_hbm [thread:$0]  (%p994_p3), %s543_s24, 128, %s1044_s5, %s523_s6  }
 0x248   : > { %s331_s23 = scalar_lea.vmem %s1099_s3, %s1018_s12 }
 0x30d   : > { %v506_v23 = vpop.f32.mrb[0].mxu1 }
 0x30e   : > { %510 = vst.msk [vmem:[%s331_s23] sm:$0xff] %vm336_vm1, %v506_v23  ;;  %v741_v24 = vpop.f32.mrb[1].mxu1 }
 0x30f PF: > { %p748_p5 = scmp.ge.s32.totalorder %s913_s22, 2  ;;  %s568_s27 = sand.u32 1, %s885_s15  }
 0x310   : > { %s569_s28 = scalar_lea.sflag [#allocation3], %s568_s27 }
 0x311   : > { %p745_p6 = pnand %p748_p5, %p1003_p8 }
 0x313   : > { %880 = dma.done.wait (!%p745_p6), %s569_s28, 128  }
 0x314   : > { %882 = vsyncadd (!%p745_p6), %s569_s28, 4294967168  ;;  %s18_s22 = sadd.s32 1, %s913_s22   ;;  %s1107_s15 = smov %s889_s16 }
 0x315   : > { %p15_p3 = scmp.ge.s32.totalorder %s18_s22, 10   ;;  %s1108_s16 = smov %s893_s17 }
 0x316   : > { %s1109_s17 = smov %s1012_s7  ;;  %s1110_s18 = smov %s905_s20 }
 0x317   : > { %s1111_s19 = smov %s909_s21  ;;  %s1112_s20 = smov %s1115_s25 }
 0x318   : > { %s1113_s21 = smov %s1119_s26  ;;  %17 = sbr.rel (!%p15_p3) target bundleno = 8 (0x8), region = 85 }
 0x31f   :  { %574 = vsyncpa [#allocation3], 1 }
 0x320   :  { %576 = vsyncpa [#allocation3 + $0x1], 1 }

// kernel: self_attention_forward.9
= control target key start
LH: loop header
LB: loop body
LE: loop exit
PB: predicated region body
PF: predicated region fallthrough
CT: control target
= control target key end

     0   :  { %8 = vsyncpa [#allocation3], 0  ;;  %s949_s0 = inlined_call_operand.vmem [shape: f32[2,4,8,8], index: 0, kind: input, shape index: {}]   ;;  %s950_s1 = inlined_call_operand.vmem [shape: f32[4,8,32], index: 1, kind: input, shape index: {}]   ;;  %s951_s2 = inlined_call_operand.vmem [shape: f32[1,32], index: 2, kind: input, shape index: {}]   ;;  %s952_s3 = inlined_call_operand.hbm [shape: f32[2,8,32], index: 3, kind: output, shape index: {}]  }
   0x1   :  { %10 = vsyncpa [#allocation3 + $0x1], 0  ;;  %s814_s12 = smov 0   ;;  %s816_s13 = smov 0  }
   0x2   :  { %s818_s14 = smov 0   ;;  %s820_s15 = smov 0  }
   0x3   :  { %s822_s16 = smov 0   ;;  %s824_s17 = smov 0  }
   0x4 LB: > { %s602_s18 = sadd.s32 4294967295, %s789_s17   ;;  %s603_s19 = sadd.s32 4294967294, %s789_s17   ;;  %s789_s17 = sphi %s824_s17, %s16_s17   ;;  %s785_s16 = sphi %s822_s16, %s959_s16   ;;  %s781_s15 = sphi %s820_s15, %s958_s15   ;;  %s777_s14 = sphi %s818_s14, %s957_s14   ;;  %s773_s13 = sphi %s816_s13, %s956_s13   ;;  %s769_s12 = sphi %s814_s12, %s955_s12  }
   0x5   : > { %s28_s20 = sadd.s32 1, %s785_s16  ;;  %s107_s21 = sadd.s32 1, %s777_s14 }
   0x6   : > { %p30_p0 = scmp.ge.s32.totalorder %s28_s20, 2  ;;  %p117_p1 = scmp.ne.s32.totalorder %s777_s14, %s773_s13 }
   0x7   : > { %p118_p2 = scmp.eq.s32.totalorder %s602_s18, 1  ;;  %p123_p3 = scmp.ne.s32.totalorder %s773_s13, %s769_s12 }
   0x8   : > { %s961_s20 = smov (%p30_p0, %s28_s20), 0  ;;  %p124_p5 = scmp.eq.s32.totalorder %s603_s19, 1 }
   0x9   : > { %p854_p4 = por %p118_p2, %p117_p1  ;;  %s102_s23 = ssub.s32 %s785_s16, %s961_s20 }
   0xa   : > { %p606_p6 = scmp.ge.s32.totalorder %s789_s17, 1  ;;  %p105_p7 = scmp.eq.s32.totalorder %s102_s23, 0 }
   0xb   : > { %p861_p8 = por %p124_p5, %p123_p3  ;;  %p159_p9 = scmp.lt.s32.totalorder %s789_s17, 3 }
   0xc   : > { %s867_s25 = scalar_select %p105_p7, %s777_s14, %s107_s21  }
   0xd   : > { %p160_p10 = pnand %p606_p6, %p159_p9 }
   0xe   : > { %v611_v0 = vld [vmem:[%s950_s1 + $0x8] sm:$0xff] (!%p160_p10)  ;;  %v195_v1 = vld [vmem:[%s950_s1] sm:$0xff] (!%p160_p10)  ;;  %p186_p11 = scmp.lt.s32.totalorder (!%p160_p10), %s781_s15, 1  ;;  %v791_v2 = vmov (!%p160_p10), 0.0   ;;  %vm792_vm0 = vmmov (!%p160_p10), 0   ;;  %vm200_vm1 = vcmask (!%p160_p10), 64512  }
   0xf   : > { %163 = sbr.rel (%p160_p10) target bundleno = 263 (0x107), region = 32  ;;  %634 = vmatprep.subr.mxu0 (!%p160_p10), %v791_v2  ;;  %639 = vmatprep.subr.mxu1 (!%p160_p10), %v791_v2  ;;  %v615_v3 = vld [vmem:[%s950_s1 + $0x10] sm:$0xff] (!%p160_p10)  ;;  %v618_v4 = vld [vmem:[%s950_s1 + $0x18] sm:$0xff] (!%p160_p10)  ;;  %s183_s18 = sand.u32 (!%p160_p10), 1, %s773_s13   ;;  %v620_v19 = vld [vmem:[%s951_s2] ss:$0 sm:$0xff] (!%p160_p10) }
  0x10   : > { %635 = vmatpush3.msra.mxu0 (!%p160_p10), %v611_v0  ;;  %636 = vmatprep.mubr.msk.f32.mxu0 (!%p160_p10), %vm792_vm0, %v791_v2  ;;  %s607_s19 = sshll.u32 (!%p160_p10), %s183_s18, 3  ;;  %s622_s26 = sshll.u32 (!%p160_p10), %s781_s15, 7  ;;  %vm511_vm2 = vcmask (!%p160_p10), 261120  }
  0x11   : > { %640 = vmatpush3.msra.mxu1 (!%p160_p10), %v195_v1  ;;  %641 = vmatprep.mubr.msk.f32.mxu1 (!%p160_p10), %vm792_vm0, %v791_v2  ;;  %s185_s27 = scalar_lea.vmem (!%p160_p10), [#allocation2], %s607_s19  ;;  %s514_s5 = scalar_lea.sflag (!%p160_p10), [#allocation3], %s183_s18 }
  0x12   : > { %644 = vmatprep.subr.mxu0 (!%p160_p10), %v791_v2  ;;  %649 = vmatprep.subr.mxu1 (!%p160_p10), %v791_v2  ;;  %s528_s28 = sshll.u32 (!%p160_p10), %s185_s27, 4  ;;  %s904_s28 = int_to_ptr.vmem [resolvable:$true] %s528_s28 }
  0x13   : > { %s711_s6 = scalar_lea.vmem (!%p160_p10), %s904_s28, 128 }
  0x14   : > { %p712_p12 = scmp.ne.s32.totalorder (!%p160_p10), %s904_s28, %s711_s6 }
  0x16   : > { %s187_s30 = scalar_select %p186_p11, %s781_s15, 1 }
  0x17   : > { %p713_p13 = pnand %p712_p12, %p854_p4  ;;  %s793_s15 = smov [#allocation2]  }
  0x18   : > { %s625_s4 = sshll.u32 %s187_s30, 5 }
  0x19   : > { %s193_s7 = scalar_lea.vmem %s949_s0, %s625_s4  ;;  %s902_s4 = scalar_lea.hbm %s952_s3, %s622_s26 }
  0x1a   : > { %v610_v5 = vld [vmem:[%s193_s7 + $0x8] sm:$0xff]  ;;  %v194_v6 = vld [vmem:[%s193_s7] sm:$0xff]  ;;  %v614_v7 = vld [vmem:[%s193_s7 + $0x10] sm:$0xff]  ;;  %p714_p0 = pneg %p713_p13 }
  0x1b   : > { %637 = vmatmul.mubr.msk.f32.vlgmr.msra.gmra.mrb[0].mxu0 %vm200_vm1, %v610_v5  ;;  %642 = vmatmul.mubr.msk.f32.vlgmr.msra.gmra.mrb[0].mxu1 %vm200_vm1, %v194_v6  ;;  %v617_v8 = vld [vmem:[%s193_s7 + $0x18] sm:$0xff]  ;;  %s715_s7 = sshll.u32 %s793_s15, 4  ;;  %s716_s7 = int_to_ptr.vmem [resolvable:$false] %s715_s7 }
  0x1c   : > { %645 = vmatpush3.msra.mxu0 %v615_v3  ;;  %650 = vmatpush3.msra.mxu1 %v618_v4  ;;  %s717_s8 = scalar_lea.vmem %s716_s7, 256  ;;  %p718_p1 = scmp.lt.s32.totalorder %s904_s28, %s716_s7 }
  0x1d   : > { %646 = vmatprep.mubr.msk.f32.mxu0 %vm792_vm0, %v791_v2  ;;  %651 = vmatprep.mubr.msk.f32.mxu1 %vm792_vm0, %v791_v2  ;;  %p719_p2 = scmp.lt.s32.totalorder %s717_s8, %s711_s6 }
  0x1f   : > { %647 = vmatmul.mubr.msk.f32.vlgmr.msra.gmra.mrb[2].mxu0 %vm200_vm1, %v614_v7  ;;  %652 = vmatmul.mubr.msk.f32.vlgmr.msra.gmra.mrb[2].mxu1 %vm200_vm1, %v617_v8  ;;  %p720_p3 = por %p719_p2, %p718_p1 }
  0x21   : > { %p721_p5 = pnand %p720_p3, %p714_p0 }
  0xee   : > { %v270_v9 = vpop.f32.mrb[0].mxu0  ;;  %v343_v10 = vpop.f32.mrb[0].mxu1 }
  0xef   : > { %v344_v11 = vadd.f32 %v343_v10, %v270_v9  ;;  %v638_v12 = vpop.f32.mrb[1].mxu0  ;;  %v643_v13 = vpop.f32.mrb[1].mxu1 }
  0xf2   : > { %v420_v14 = vpop.f32.mrb[2].mxu0  ;;  %v498_v15 = vpop.f32.mrb[2].mxu1 }
  0xf3   : > { %v424_v16 = vadd.f32 %v420_v14, %v344_v11  ;;  %v648_v17 = vpop.f32.mrb[3].mxu0  ;;  %v653_v18 = vpop.f32.mrb[3].mxu1 }
  0xf5   : > { %v502_v20 = vadd.f32 %v498_v15, %v424_v16 }
  0xf7   : > { %v510_v21 = vadd.f32 %v620_v19, %v502_v20 }
  0xf9   : > { %512 = vst.msk [vmem:[%s185_s27] sm:$0xff] %vm511_vm2, %v510_v21 }
  0xfa   : > { %724 = shalt.err (!%p721_p5)
}
  0xfb   : > { %s725_s9 = scalar_lea.hbm %s902_s4, 128  ;;  %s729_s18 = scalar_lea.hbm %s952_s3, 256 }
  0xfc   : > { %p726_p6 = scmp.ne.s32.totalorder %s902_s4, %s725_s9  ;;  %p730_p10 = scmp.lt.u32.totalorder %s902_s4, %s952_s3 }
  0xfd   : > { %p731_p11 = scmp.lt.u32.totalorder %s729_s18, %s725_s9  ;;  %p733_p13 = scmp.lt.u32.totalorder %s725_s9, %s902_s4 }
  0xfe   : > { %p727_p7 = pnand %p726_p6, %p854_p4 }
  0xff   : > { %p732_p12 = por %p731_p11, %p730_p10 }
 0x100   : > { %p728_p9 = pneg %p727_p7 }
 0x101   : > { %p734_p0 = por %p733_p13, %p732_p12 }
 0x103   : > { %p735_p1 = pnand %p734_p0, %p728_p9 }
 0x105   : > { %738 = shalt.err (!%p735_p1)
}
 0x106   : > { %654 = dma.vmem_to_hbm [thread:$0]  (%p854_p4), %s904_s28, 128, %s902_s4, %s514_s5  }
 0x107 PF: > { %p660_p2 = scmp.ge.s32.totalorder %s789_s17, 2  ;;  %s540_s23 = sand.u32 1, %s769_s12  }
 0x108   : > { %s541_s26 = scalar_lea.sflag [#allocation3], %s540_s23 }
 0x109   : > { %p657_p3 = pnand %p660_p2, %p861_p8 }
 0x10b   : > { %764 = dma.done.wait (!%p657_p3), %s541_s26, 128  }
 0x10c   : > { %766 = vsyncadd (!%p657_p3), %s541_s26, 4294967168  ;;  %s16_s17 = sadd.s32 1, %s789_s17   ;;  %s955_s12 = smov %s773_s13 }
 0x10d   : > { %p13_p5 = scmp.ge.s32.totalorder %s16_s17, 4   ;;  %s956_s13 = smov %s777_s14 }
 0x10e   : > { %s957_s14 = smov %s867_s25  ;;  %s958_s15 = smov %s785_s16 }
 0x10f   : > { %s959_s16 = smov %s961_s20  ;;  %15 = sbr.rel (!%p13_p5) target bundleno = 4 (0x4), region = 73 }
 0x116   :  { %546 = vsyncpa [#allocation3], 1 }
 0x117   :  { %548 = vsyncpa [#allocation3 + $0x1], 1 }

</bundles_post_ra>
